<compile_context>
chip_gen: v7x
topology: tpu7x:2x2x1
jax: 0.10.0
libtpu: 0.0.40
codegen_flags: <defaults>
</compile_context>

<pallas_src>
import jax
import jax.numpy as jnp
from jax.experimental import pallas as pl
from jax.experimental.pallas import tpu as pltpu


def _round_up(x: int, mult: int) -> int:
    return ((x + mult - 1) // mult) * mult


def _low_rank_rotate_kernel(x_ref, w_ref, o_ref):
    # In-kernel cast keeps the PyTorch contract x.to(weight.dtype) @ weight
    # while letting the HBM read of x happen at x's native dtype.
    x = x_ref[...].astype(w_ref.dtype)
    o_ref[...] = jnp.dot(
        x, w_ref[...], preferred_element_type=jnp.float32
    ).astype(o_ref.dtype)


def low_rank_rotate(
    x,
    weight,
    *,
    target_tile_rows: int = 1024,
    vmem_budget_bytes: int = 24 * 1024 * 1024,
    small_input_bytes: int = 256 * 1024,
):
    """Apply x @ weight via a row-tiled Pallas kernel. x: (..., n), weight: (n, m)."""
    n, m = weight.shape
    orig_lead = x.shape[:-1]
    assert x.shape[-1] == n, f"last dim of x ({x.shape[-1]}) must equal n ({n})"

    rows = 1
    for d in orig_lead:
        rows *= int(d)

    out_dtype = weight.dtype
    w_is = jnp.dtype(out_dtype).itemsize
    x_is = jnp.dtype(x.dtype).itemsize

    # ---- tiny-input fast path --------------------------------------------
    # For very small inputs, pallas_call launch overhead dominates and XLA can
    # fuse the matmul into neighbors; just do it directly.
    if rows == 0 or rows * n * x_is <= small_input_bytes:
        return jnp.matmul(x.astype(out_dtype), weight)

    x2d = x.reshape(rows, n)  # no cast, no pad: zero extra HBM passes over x

    # ---- choose the row tile from a VMEM budget ---------------------------
    # double-buffered x tile (x dtype) + double-buffered out tile (w dtype)
    # + (double-buffered) resident weight.
    w_bytes = n * m * w_is
    per_row_bytes = 2 * n * x_is + 2 * m * w_is
    tile_from_budget = max(8, (vmem_budget_bytes - 2 * w_bytes) // max(per_row_bytes, 1))

    rows8 = _round_up(rows, 8)
    tile_r = min(int(target_tile_rows), int(tile_from_budget), rows8)
    tile_r = max(8, (tile_r // 8) * 8)  # sublane alignment

    # On large inputs keep >= 4 grid steps (2 TCs x double-buffer on v7x /
    # megacore split) without dropping the tile below ~512 rows.
    if rows >= 4 * 512:
        tile_r = min(tile_r, _round_up(pl.cdiv(rows, 4), 8))

    grid = (pl.cdiv(rows, tile_r),)  # partial last block handled by Pallas

    cost = pl.CostEstimate(
        flops=2 * rows * n * m,
        transcendentals=0,
        bytes_accessed=(
            rows * n * x_is      # x read (native dtype)
            + w_bytes            # weight read
            + rows * m * w_is    # output write
        ),
    )

    est_vmem = 2 * tile_r * n * x_is + 2 * tile_r * m * w_is + 2 * w_bytes
    vmem_limit = min(max(2 * est_vmem, 8 * 1024 * 1024), 48 * 1024 * 1024)

    out2d = pl.pallas_call(
        _low_rank_rotate_kernel,
        out_shape=jax.ShapeDtypeStruct((rows, m), out_dtype),
        grid_spec=pltpu.PrefetchScalarGridSpec(
            num_scalar_prefetch=0,
            grid=grid,
            in_specs=[
                # x: one row-tile per grid step (pipelined HBM->VMEM DMA),
                # read at x's native dtype; cast happens in-kernel.
                pl.BlockSpec((tile_r, n), lambda i: (i, 0)),
                # weight: full array, grid-invariant index -> DMA'd once.
                pl.BlockSpec((n, m), lambda i: (0, 0)),
            ],
            out_specs=pl.BlockSpec((tile_r, m), lambda i: (i, 0)),
        ),
        compiler_params=pltpu.CompilerParams(
            # Row tiles are independent (weight broadcast) -> parallel lets
            # v7x shard the row axis across its two TensorCores.
            dimension_semantics=("parallel",),
            vmem_limit_bytes=vmem_limit,
        ),
        cost_estimate=cost,
    )(x2d, weight)

    return out2d.reshape(*orig_lead, m)


def make_orthogonal_weight(key, n, m, dtype=jnp.float32):
    """Deterministic orthogonal init (columns orthonormal), mimicking
    torch.nn.init.orthogonal_ for an (n, m) parameter with n >= m."""
    assert n >= m, f"orthogonal init expects n >= m (got n={n}, m={m})"
    a = jax.random.normal(key, (n, m), dtype=jnp.float32)
    q, r = jnp.linalg.qr(a)
    d = jnp.sign(jnp.diag(r))
    d = jnp.where(d == 0, 1.0, d)  # avoid zeroing a column in degenerate cases
    q = q * d[None, :]
    return q.astype(dtype)


if __name__ == "__main__":
    key = jax.random.PRNGKey(0)
    k_w1, k_w2, k_x1, k_x2, k_x3 = jax.random.split(key, 5)

    # Case 1: tiny input (batch=2, seq=8, n=32, m=8) -> fast path (plain matmul).
    n1, m1 = 32, 8
    w1 = make_orthogonal_weight(k_w1, n1, m1, dtype=jnp.float32)
    x1 = jax.random.normal(k_x1, (2, 8, n1), dtype=jnp.float32)
    out1 = jax.block_until_ready(low_rank_rotate(x1, w1))
    ref1 = jnp.matmul(x1.astype(w1.dtype), w1)
    assert out1.shape == (2, 8, m1)
    assert out1.dtype == w1.dtype
    assert jnp.allclose(out1, ref1, atol=1e-5, rtol=1e-5)

    # Case 2: Pallas kernel path with a ragged row count (4*515 = 2060 rows ->
    # partial last block, no padding copy).
    n2, m2 = 64, 8
    w2 = make_orthogonal_weight(k_w2, n2, m2, dtype=jnp.float32)
    x2 = jax.random.normal(k_x2, (4, 515, n2), dtype=jnp.float32)
    out2 = jax.block_until_ready(low_rank_rotate(x2, w2))
    ref2 = jnp.matmul(x2.astype(w2.dtype), w2)
    assert out2.shape == (4, 515, m2)
    assert out2.dtype == w2.dtype
    assert jnp.allclose(out2, ref2, atol=1e-2, rtol=1e-2)

    # Case 3: mixed dtype (f32 x, bf16 weight) -> exercises the in-kernel cast.
    w3 = w2.astype(jnp.bfloat16)
    x3 = jax.random.normal(k_x3, (4, 515, n2), dtype=jnp.float32)
    out3 = jax.block_until_ready(low_rank_rotate(x3, w3))
    ref3 = jnp.matmul(x3.astype(jnp.bfloat16), w3)
    assert out3.shape == (4, 515, m2)
    assert out3.dtype == jnp.bfloat16
    assert jnp.allclose(
        out3.astype(jnp.float32), ref3.astype(jnp.float32), atol=3e-2, rtol=3e-2
    )

    print("KERNEL_OK")
</pallas_src>

<mosaic_0001>
module attributes {stable_mosaic.version = 11 : i64} {
  func.func @_low_rank_rotate_kernel(%arg0: i32, %arg1: memref<520x64xf32, #tpu.memory_space<vmem>>, %arg2: memref<64x8xf32, #tpu.memory_space<vmem>>, %arg3: memref<520x8xf32, #tpu.memory_space<vmem>>) attributes {dimension_semantics = [#tpu.dimension_semantics<parallel>], iteration_bounds = array<i64: 4>, scalar_prefetch = 0 : i64, scratch_operands = 0 : i64, tpu.core_type = #tpu.core_type<tc>, window_params = [{transform_indices = @transform_0, window_bounds = array<i64: 520, 64>}, {pipeline_mode = #tpu.pipeline_mode<synchronous>, transform_indices = @transform_1, window_bounds = array<i64: 64, 8>}, {transform_indices = @transform_2, window_bounds = array<i64: 520, 8>}]} {
    %c0 = arith.constant 0 : index
    %c0_0 = arith.constant 0 : index
    %0 = vector.load %arg1[%c0, %c0_0] : memref<520x64xf32, #tpu.memory_space<vmem>>, vector<520x64xf32>
    %c0_1 = arith.constant 0 : index
    %c0_2 = arith.constant 0 : index
    %1 = vector.load %arg2[%c0_1, %c0_2] : memref<64x8xf32, #tpu.memory_space<vmem>>, vector<64x8xf32>
    %cst = arith.constant dense<0.000000e+00> : vector<520x8xf32>
    %2 = tpu.matmul %0, %1, %cst {dimension_numbers = #tpu.dot_dimension_numbers<[1], [0], [0], [1], [0, 0, 1, 1], [], []>} : vector<520x64xf32>, vector<64x8xf32>, vector<520x8xf32> -> vector<520x8xf32>
    %c0_3 = arith.constant 0 : index
    %c0_4 = arith.constant 0 : index
    %3 = vector.load %arg3[%c0_3, %c0_4] : memref<520x8xf32, #tpu.memory_space<vmem>>, vector<520x8xf32>
    tpu.vector_store %arg3[%c0_3, %c0_4], %2 {strides = array<i32>} : memref<520x8xf32, #tpu.memory_space<vmem>>, vector<520x8xf32>,
    return
  }
  func.func @transform_0(%arg0: i32) -> (i32, i32) {
    %c0_i32 = arith.constant 0 : i32
    %c0_i32_0 = arith.constant 0 : i32
    return %arg0, %c0_i32 : i32, i32
  }
  func.func @transform_1(%arg0: i32) -> (i32, i32) {
    %c0_i32 = arith.constant 0 : i32
    %c0_i32_0 = arith.constant 0 : i32
    %c0_i32_1 = arith.constant 0 : i32
    return %c0_i32, %c0_i32_0 : i32, i32
  }
  func.func @transform_2(%arg0: i32) -> (i32, i32) {
    %c0_i32 = arith.constant 0 : i32
    %c0_i32_0 = arith.constant 0 : i32
    return %arg0, %c0_i32 : i32, i32
  }
}

</mosaic_0001>

<bundles_post_ra>
// kernel: tpu_custom_call.1
= control target key start
LH: loop header
LB: loop body
LE: loop exit
PB: predicated region body
PF: predicated region fallthrough
CT: control target
= control target key end

     0   :  { %s1947_s9 = smov 0   ;;  %s1949_s10 = smov 0   ;;  %s2609_s0 = inlined_call_operand.vmem [shape: f32[2060,64], index: 0, kind: input, shape index: {}]   ;;  %s2610_s1 = inlined_call_operand.vmem [shape: f32[64,8], index: 1, kind: input, shape index: {}]   ;;  %s2611_s2 = inlined_call_operand.vmem [shape: f32[2060,8], index: 2, kind: output, shape index: {}]  }
   0x1   :  { %s1951_s11 = smov 0  }
   0x2 LB: > { %s1960_s12 = sadd.s32 4294967295, %s1895_s11   ;;  %s1962_s13 = sadd.s32 1, %s1895_s11   ;;  %s1895_s11 = sphi %s1951_s11, %s2620_s11   ;;  %s1891_s10 = sphi %s1949_s10, %s2619_s10   ;;  %s1887_s9 = sphi %s1947_s9, %s2618_s9  }
   0x3   : > { %s63_s14 = ssub.s32 %s1895_s11, %s1962_s13  ;;  %s66_s15 = sadd.s32 1, %s1891_s10 }
   0x4   : > { %p64_p0 = scmp.eq.s32.totalorder %s63_s14, 0  ;;  %p76_p1 = scmp.ne.s32.totalorder %s1891_s10, %s1887_s9 }
   0x5   : > { %p77_p2 = scmp.eq.s32.totalorder %s1960_s12, 3  ;;  %p1360_p3 = scmp.ge.s32.totalorder %s1895_s11, 1 }
   0x6   : > { %s1970_s16 = scalar_select %p64_p0, %s1891_s10, %s66_s15  }
   0x7   : > { %p1972_p4 = por %p77_p2, %p76_p1  ;;  %p121_p5 = scmp.lt.s32.totalorder %s1895_s11, 5 }
   0x9   : > { %p122_p6 = pnand %p1360_p3, %p121_p5 }
   0xa   : > { %v230_v0 = vld [vmem:[%s2610_s1] sm:$0xff] (!%p122_p6)  ;;  %v231_v1 = vld [vmem:[%s2610_s1 + $0x8] sm:$0xff] (!%p122_p6)  ;;  %v232_v2 = vld [vmem:[%s2610_s1 + $0x10] sm:$0xff] (!%p122_p6)  ;;  %v1929_v3 = vmov (!%p122_p6), 0.0|0.0   ;;  %s1989_s26 = smul.u32 (!%p122_p6), 65, %s1960_s12  ;;  %vm1930_vm0 = vmmov (!%p122_p6), 0  }
   0xb   : > { %125 = sbr.rel (%p122_p6) target bundleno = 441 (0x1b9), region = 28  ;;  %1729 = vmatprep.subr.bf16.mxu0 (!%p122_p6), %v1929_v3  ;;  %v1730_v4 = vpack.c.bf16 (!%p122_p6), %v231_v1, %v230_v0  ;;  %1741 = vmatprep.subr.bf16.mxu1 (!%p122_p6), %v1929_v3  ;;  %v233_v5 = vld [vmem:[%s2610_s1 + $0x18] sm:$0xff] (!%p122_p6)  ;;  %v1931_v6 = vmov (!%p122_p6), 0.0   ;;  %v234_v8 = vld [vmem:[%s2610_s1 + $0x20] sm:$0xff] (!%p122_p6)  ;;  %v235_v9 = vld [vmem:[%s2610_s1 + $0x28] sm:$0xff] (!%p122_p6)  ;;  %vm238_vm1 = vcmask (!%p122_p6), 523264  }
   0xc   : > { %1534 = vmatprep.mubr.msk.f32.mxu0 (!%p122_p6), %vm1930_vm0, %v1931_v6  ;;  %1633 = vmatprep.mubr.msk.f32.mxu1 (!%p122_p6), %vm1930_vm0, %v1931_v6  ;;  %v1733_v7 = vpack.c.bf16 (!%p122_p6), %v233_v5, %v232_v2  ;;  %p151_p7 = scmp.lt.s32.totalorder (!%p122_p6), %s1989_s26, 257  ;;  %v1736_v10 = vpack.c.bf16 (!%p122_p6), %v235_v9, %v234_v8  ;;  %v236_v11 = vld [vmem:[%s2610_s1 + $0x30] sm:$0xff] (!%p122_p6)  ;;  %v237_v12 = vld [vmem:[%s2610_s1 + $0x38] sm:$0xff] (!%p122_p6)  ;;  %s143_s18 = sand.u32 (!%p122_p6), 1, %s1887_s9   ;;  %vm824_vm2 = vcmask (!%p122_p6), 64512  }
   0xd   : > { %1731 = vmatpush3.bf16.msra.mxu0 (!%p122_p6), %v1730_v4  ;;  %1745 = vmatpush3.bf16.msra.mxu1 (!%p122_p6), %v1730_v4  ;;  %v1739_v13 = vpack.c.bf16 (!%p122_p6), %v237_v12, %v236_v11  ;;  %s1749_s19 = smul.u32 (!%p122_p6), 520, %s143_s18 }
   0xe   : > { %1732 = vmatprep.subr.bf16.mxu0 (!%p122_p6), %v1929_v3  ;;  %1742 = vmatprep.subr.bf16.mxu1 (!%p122_p6), %v1929_v3 }
   0xf   : > { %s2271_s20 = scalar_lea.vmem (!%p122_p6), [#allocation2], %s1749_s19  }
  0x11   : > { %1734 = vmatpush3.bf16.msra.mxu0 (!%p122_p6), %v1733_v7  ;;  %1746 = vmatpush3.bf16.msra.mxu1 (!%p122_p6), %v1733_v7 }
  0x12   : > { %s152_s3 = scalar_select %p151_p7, %s1989_s26, 257  ;;  %1735 = vmatprep.subr.bf16.mxu0 %v1929_v3  ;;  %1743 = vmatprep.subr.bf16.mxu1 %v1929_v3 }
  0x13   : > { %s898_s9 = ssub.s32 (%p1972_p4), 258, %s1989_s26  ;;  %s1442_s21 = smul.u32 (%p1972_p4), 520, %s1960_s12 }
  0x14   : > { %s1361_s8 = sshll.u32 %s152_s3, 3  ;;  %p899_p8 = scmp.lt.s32.totalorder (%p1972_p4), %s898_s9, 65 }
  0x15   : > { %1737 = vmatpush3.bf16.msra.mxu0 %v1736_v10  ;;  %1747 = vmatpush3.bf16.msra.mxu1 %v1736_v10  ;;  %s2012_s15 = scalar_lea.vmem %s2609_s0, %s1361_s8  ;;  %s2410_s24 = scalar_lea.vmem (%p1972_p4), %s2611_s2, %s1442_s21  }
  0x16   : > { %1738 = vmatprep.subr.bf16.mxu0 %v1929_v3  ;;  %1744 = vmatprep.subr.bf16.mxu1 %v1929_v3  ;;  %v165_v14 = vld [vmem:[%s2012_s15] sm:$0xff]  ;;  %v198_v15 = vld [vmem:[%s2012_s15 + $0x108] sm:$0xff]  ;;  %v199_v17 = vld [vmem:[%s2012_s15 + $0x110] sm:$0xff] }
  0x17   : > { %v166_v16 = vld [vmem:[%s2012_s15 + $0x8] sm:$0xff]  ;;  %v167_v18 = vld [vmem:[%s2012_s15 + $0x10] sm:$0xff]  ;;  %v200_v19 = vld [vmem:[%s2012_s15 + $0x118] sm:$0xff] }
  0x18   : > { %v168_v20 = vld [vmem:[%s2012_s15 + $0x18] sm:$0xff]  ;;  %v201_v21 = vld [vmem:[%s2012_s15 + $0x120] sm:$0xff]  ;;  %v202_v23 = vld [vmem:[%s2012_s15 + $0x128] sm:$0xff] }
  0x19   : > { %1740 = vmatpush3.bf16.msra.mxu0 %v1739_v13  ;;  %1748 = vmatpush3.bf16.msra.mxu1 %v1739_v13  ;;  %v169_v22 = vld [vmem:[%s2012_s15 + $0x20] sm:$0xff]  ;;  %v170_v24 = vld [vmem:[%s2012_s15 + $0x28] sm:$0xff]  ;;  %v203_v25 = vld [vmem:[%s2012_s15 + $0x130] sm:$0xff] }
  0x1a   : > { %v171_v26 = vld [vmem:[%s2012_s15 + $0x30] sm:$0xff]  ;;  %v204_v27 = vld [vmem:[%s2012_s15 + $0x138] sm:$0xff]  ;;  %v205_v29 = vld [vmem:[%s2012_s15 + $0x140] sm:$0xff] }
  0x1b   : > { %v172_v28 = vld [vmem:[%s2012_s15 + $0x38] sm:$0xff]  ;;  %v173_v30 = vld [vmem:[%s2012_s15 + $0x40] sm:$0xff]  ;;  %v206_v31 = vld [vmem:[%s2012_s15 + $0x148] sm:$0xff] }
  0x1c   : > { %1535 = vmatmul.mubr.msk.f32.vlgmr.msra.gmra.mrb[0].mxu0 %vm238_vm1, %v165_v14  ;;  %1634 = vmatmul.mubr.msk.f32.vlgmr.msra.gmra.mrb[0].mxu1 %vm238_vm1, %v198_v15  ;;  %v174_v32 = vld [vmem:[%s2012_s15 + $0x48] sm:$0xff]  ;;  %v207_v33 = vld [vmem:[%s2012_s15 + $0x150] sm:$0xff]  ;;  %v208_v35 = vld [vmem:[%s2012_s15 + $0x158] sm:$0xff] }
  0x1d   : > { %1537 = vmatprep.mubr.msk.f32.mxu0 %vm1930_vm0, %v1931_v6  ;;  %1636 = vmatprep.mubr.msk.f32.mxu1 %vm1930_vm0, %v1931_v6  ;;  %v175_v34 = vld [vmem:[%s2012_s15 + $0x50] sm:$0xff]  ;;  %v176_v36 = vld [vmem:[%s2012_s15 + $0x58] sm:$0xff]  ;;  %v209_v37 = vld [vmem:[%s2012_s15 + $0x160] sm:$0xff] }
  0x1e   : > { %v177_v38 = vld [vmem:[%s2012_s15 + $0x60] sm:$0xff]  ;;  %v210_v39 = vld [vmem:[%s2012_s15 + $0x168] sm:$0xff]  ;;  %v211_v41 = vld [vmem:[%s2012_s15 + $0x170] sm:$0xff] }
  0x1f   : > { %v178_v40 = vld [vmem:[%s2012_s15 + $0x68] sm:$0xff]  ;;  %v179_v42 = vld [vmem:[%s2012_s15 + $0x70] sm:$0xff]  ;;  %v212_v43 = vld [vmem:[%s2012_s15 + $0x178] sm:$0xff] }
  0x20   : > { %1538 = vmatmul.mubr.msk.f32.gmra.mrb[2].mxu0 %vm238_vm1, %v166_v16  ;;  %1637 = vmatmul.mubr.msk.f32.gmra.mrb[2].mxu1 %vm238_vm1, %v199_v17  ;;  %v180_v44 = vld [vmem:[%s2012_s15 + $0x78] sm:$0xff]  ;;  %v213_v45 = vld [vmem:[%s2012_s15 + $0x180] sm:$0xff]  ;;  %v214_v47 = vld [vmem:[%s2012_s15 + $0x188] sm:$0xff] }
  0x21   : > { %1540 = vmatprep.mubr.msk.f32.mxu0 %vm1930_vm0, %v1931_v6  ;;  %1639 = vmatprep.mubr.msk.f32.mxu1 %vm1930_vm0, %v1931_v6  ;;  %v181_v46 = vld [vmem:[%s2012_s15 + $0x80] sm:$0xff]  ;;  %v182_v48 = vld [vmem:[%s2012_s15 + $0x88] sm:$0xff]  ;;  %v215_v49 = vld [vmem:[%s2012_s15 + $0x190] sm:$0xff] }
  0x22   : > { %v183_v50 = vld [vmem:[%s2012_s15 + $0x90] sm:$0xff]  ;;  %v216_v51 = vld [vmem:[%s2012_s15 + $0x198] sm:$0xff]  ;;  %v217_v53 = vld [vmem:[%s2012_s15 + $0x1a0] sm:$0xff] }
  0x23   : > { %v184_v52 = vld [vmem:[%s2012_s15 + $0x98] sm:$0xff]  ;;  %v185_v54 = vld [vmem:[%s2012_s15 + $0xa0] sm:$0xff]  ;;  %v218_v55 = vld [vmem:[%s2012_s15 + $0x1a8] sm:$0xff] }
  0x24   : > { %1541 = vmatmul.mubr.msk.f32.gmra.mrb[4].mxu0 %vm238_vm1, %v167_v18  ;;  %1640 = vmatmul.mubr.msk.f32.gmra.mrb[4].mxu1 %vm238_vm1, %v200_v19  ;;  %v186_v56 = vld [vmem:[%s2012_s15 + $0xa8] sm:$0xff]  ;;  %v219_v57 = vld [vmem:[%s2012_s15 + $0x1b0] sm:$0xff]  ;;  %v220_v59 = vld [vmem:[%s2012_s15 + $0x1b8] sm:$0xff] }
  0x25   : > { %1543 = vmatprep.mubr.msk.f32.mxu0 %vm1930_vm0, %v1931_v6  ;;  %1642 = vmatprep.mubr.msk.f32.mxu1 %vm1930_vm0, %v1931_v6  ;;  %v187_v58 = vld [vmem:[%s2012_s15 + $0xb0] sm:$0xff]  ;;  %v188_v60 = vld [vmem:[%s2012_s15 + $0xb8] sm:$0xff]  ;;  %v221_v61 = vld [vmem:[%s2012_s15 + $0x1c0] sm:$0xff] }
  0x26   : > { %v189_v62 = vld [vmem:[%s2012_s15 + $0xc0] sm:$0xff]  ;;  %v222_v63 = vld [vmem:[%s2012_s15 + $0x1c8] sm:$0xff]  ;;  %v223_v1 = vld [vmem:[%s2012_s15 + $0x1d0] sm:$0xff] }
  0x27   : > { %v190_v0 = vld [vmem:[%s2012_s15 + $0xc8] sm:$0xff]  ;;  %v191_v2 = vld [vmem:[%s2012_s15 + $0xd0] sm:$0xff]  ;;  %v224_v3 = vld [vmem:[%s2012_s15 + $0x1d8] sm:$0xff] }
  0x28   : > { %1544 = vmatmul.mubr.msk.f32.gmra.mrb[6].mxu0 %vm238_vm1, %v168_v20  ;;  %1643 = vmatmul.mubr.msk.f32.gmra.mrb[6].mxu1 %vm238_vm1, %v201_v21  ;;  %v192_v4 = vld [vmem:[%s2012_s15 + $0xd8] sm:$0xff]  ;;  %v225_v5 = vld [vmem:[%s2012_s15 + $0x1e0] sm:$0xff]  ;;  %v226_v8 = vld [vmem:[%s2012_s15 + $0x1e8] sm:$0xff] }
  0x29   : > { %1546 = vmatprep.mubr.msk.f32.mxu0 %vm1930_vm0, %v1931_v6  ;;  %1645 = vmatprep.mubr.msk.f32.mxu1 %vm1930_vm0, %v1931_v6  ;;  %v193_v7 = vld [vmem:[%s2012_s15 + $0xe0] sm:$0xff]  ;;  %v194_v9 = vld [vmem:[%s2012_s15 + $0xe8] sm:$0xff]  ;;  %v227_v10 = vld [vmem:[%s2012_s15 + $0x1f0] sm:$0xff] }
  0x2a   : > { %v195_v11 = vld [vmem:[%s2012_s15 + $0xf0] sm:$0xff]  ;;  %v228_v12 = vld [vmem:[%s2012_s15 + $0x1f8] sm:$0xff]  ;;  %v229_v14 = vld [vmem:[%s2012_s15 + $0x200] sm:$0xff] }
  0x2b   : > { %v196_v13 = vld [vmem:[%s2012_s15 + $0xf8] sm:$0xff]  ;;  %v197_v15 = vld [vmem:[%s2012_s15 + $0x100] sm:$0xff] }
  0x2c   : > { %1547 = vmatmul.mubr.msk.f32.gmra.mrb[8].mxu0 %vm238_vm1, %v169_v22  ;;  %1646 = vmatmul.mubr.msk.f32.gmra.mrb[8].mxu1 %vm238_vm1, %v202_v23 }
  0x2d   : > { %1549 = vmatprep.mubr.msk.f32.mxu0 %vm1930_vm0, %v1931_v6  ;;  %1648 = vmatprep.mubr.msk.f32.mxu1 %vm1930_vm0, %v1931_v6 }
  0x30   : > { %1550 = vmatmul.mubr.msk.f32.gmra.mrb[10].mxu0 %vm238_vm1, %v170_v24  ;;  %1649 = vmatmul.mubr.msk.f32.gmra.mrb[10].mxu1 %vm238_vm1, %v203_v25 }
  0x31   : > { %1552 = vmatprep.mubr.msk.f32.mxu0 %vm1930_vm0, %v1931_v6  ;;  %1651 = vmatprep.mubr.msk.f32.mxu1 %vm1930_vm0, %v1931_v6 }
  0x34   : > { %1553 = vmatmul.mubr.msk.f32.gmra.mrb[12].mxu0 %vm238_vm1, %v171_v26  ;;  %1652 = vmatmul.mubr.msk.f32.gmra.mrb[12].mxu1 %vm238_vm1, %v204_v27 }
  0x35   : > { %1555 = vmatprep.mubr.msk.f32.mxu0 %vm1930_vm0, %v1931_v6  ;;  %1654 = vmatprep.mubr.msk.f32.mxu1 %vm1930_vm0, %v1931_v6 }
  0x38   : > { %1556 = vmatmul.mubr.msk.f32.gmra.mrb[14].mxu0 %vm238_vm1, %v172_v28  ;;  %1655 = vmatmul.mubr.msk.f32.gmra.mrb[14].mxu1 %vm238_vm1, %v205_v29 }
  0x39   : > { %1558 = vmatprep.mubr.msk.f32.mxu0 %vm1930_vm0, %v1931_v6  ;;  %1657 = vmatprep.mubr.msk.f32.mxu1 %vm1930_vm0, %v1931_v6 }
  0x3c   : > { %1559 = vmatmul.mubr.msk.f32.gmra.mrb[16].mxu0 %vm238_vm1, %v173_v30  ;;  %1658 = vmatmul.mubr.msk.f32.gmra.mrb[16].mxu1 %vm238_vm1, %v206_v31 }
  0x3d   : > { %1561 = vmatprep.mubr.msk.f32.mxu0 %vm1930_vm0, %v1931_v6  ;;  %1660 = vmatprep.mubr.msk.f32.mxu1 %vm1930_vm0, %v1931_v6 }
  0x40   : > { %1562 = vmatmul.mubr.msk.f32.gmra.mrb[18].mxu0 %vm238_vm1, %v174_v32  ;;  %1661 = vmatmul.mubr.msk.f32.gmra.mrb[18].mxu1 %vm238_vm1, %v207_v33 }
  0x41   : > { %1564 = vmatprep.mubr.msk.f32.mxu0 %vm1930_vm0, %v1931_v6  ;;  %1663 = vmatprep.mubr.msk.f32.mxu1 %vm1930_vm0, %v1931_v6 }
  0x44   : > { %1565 = vmatmul.mubr.msk.f32.gmra.mrb[20].mxu0 %vm238_vm1, %v175_v34  ;;  %1664 = vmatmul.mubr.msk.f32.gmra.mrb[20].mxu1 %vm238_vm1, %v208_v35 }
  0x45   : > { %1567 = vmatprep.mubr.msk.f32.mxu0 %vm1930_vm0, %v1931_v6  ;;  %1666 = vmatprep.mubr.msk.f32.mxu1 %vm1930_vm0, %v1931_v6 }
  0x48   : > { %1568 = vmatmul.mubr.msk.f32.gmra.mrb[22].mxu0 %vm238_vm1, %v176_v36  ;;  %1667 = vmatmul.mubr.msk.f32.gmra.mrb[22].mxu1 %vm238_vm1, %v209_v37 }
  0x49   : > { %1570 = vmatprep.mubr.msk.f32.mxu0 %vm1930_vm0, %v1931_v6  ;;  %1669 = vmatprep.mubr.msk.f32.mxu1 %vm1930_vm0, %v1931_v6 }
  0x4c   : > { %1571 = vmatmul.mubr.msk.f32.gmra.mrb[24].mxu0 %vm238_vm1, %v177_v38  ;;  %1670 = vmatmul.mubr.msk.f32.gmra.mrb[24].mxu1 %vm238_vm1, %v210_v39 }
  0x4d   : > { %1573 = vmatprep.mubr.msk.f32.mxu0 %vm1930_vm0, %v1931_v6  ;;  %1672 = vmatprep.mubr.msk.f32.mxu1 %vm1930_vm0, %v1931_v6 }
  0x50   : > { %1574 = vmatmul.mubr.msk.f32.gmra.mrb[26].mxu0 %vm238_vm1, %v178_v40  ;;  %1673 = vmatmul.mubr.msk.f32.gmra.mrb[26].mxu1 %vm238_vm1, %v211_v41 }
  0x51   : > { %1576 = vmatprep.mubr.msk.f32.mxu0 %vm1930_vm0, %v1931_v6  ;;  %1675 = vmatprep.mubr.msk.f32.mxu1 %vm1930_vm0, %v1931_v6 }
  0x54   : > { %1577 = vmatmul.mubr.msk.f32.gmra.mrb[28].mxu0 %vm238_vm1, %v179_v42  ;;  %1676 = vmatmul.mubr.msk.f32.gmra.mrb[28].mxu1 %vm238_vm1, %v212_v43 }
  0x55   : > { %1579 = vmatprep.mubr.msk.f32.mxu0 %vm1930_vm0, %v1931_v6  ;;  %1678 = vmatprep.mubr.msk.f32.mxu1 %vm1930_vm0, %v1931_v6 }
  0x58   : > { %1580 = vmatmul.mubr.msk.f32.gmra.mrb[30].mxu0 %vm238_vm1, %v180_v44  ;;  %1679 = vmatmul.mubr.msk.f32.gmra.mrb[30].mxu1 %vm238_vm1, %v213_v45 }
  0x59   : > { %1582 = vmatprep.mubr.msk.f32.mxu0 %vm1930_vm0, %v1931_v6  ;;  %1681 = vmatprep.mubr.msk.f32.mxu1 %vm1930_vm0, %v1931_v6 }
  0x5c   : > { %1583 = vmatmul.mubr.msk.f32.gmra.mrb[32].mxu0 %vm238_vm1, %v181_v46  ;;  %1682 = vmatmul.mubr.msk.f32.gmra.mrb[32].mxu1 %vm238_vm1, %v214_v47 }
  0x5d   : > { %1585 = vmatprep.mubr.msk.f32.mxu0 %vm1930_vm0, %v1931_v6  ;;  %1684 = vmatprep.mubr.msk.f32.mxu1 %vm1930_vm0, %v1931_v6 }
  0x60   : > { %1586 = vmatmul.mubr.msk.f32.gmra.mrb[34].mxu0 %vm238_vm1, %v182_v48  ;;  %1685 = vmatmul.mubr.msk.f32.gmra.mrb[34].mxu1 %vm238_vm1, %v215_v49 }
  0x61   : > { %1588 = vmatprep.mubr.msk.f32.mxu0 %vm1930_vm0, %v1931_v6  ;;  %1687 = vmatprep.mubr.msk.f32.mxu1 %vm1930_vm0, %v1931_v6 }
  0x64   : > { %1589 = vmatmul.mubr.msk.f32.gmra.mrb[36].mxu0 %vm238_vm1, %v183_v50  ;;  %1688 = vmatmul.mubr.msk.f32.gmra.mrb[36].mxu1 %vm238_vm1, %v216_v51 }
  0x65   : > { %1591 = vmatprep.mubr.msk.f32.mxu0 %vm1930_vm0, %v1931_v6  ;;  %1690 = vmatprep.mubr.msk.f32.mxu1 %vm1930_vm0, %v1931_v6 }
  0x68   : > { %1592 = vmatmul.mubr.msk.f32.gmra.mrb[38].mxu0 %vm238_vm1, %v184_v52  ;;  %1691 = vmatmul.mubr.msk.f32.gmra.mrb[38].mxu1 %vm238_vm1, %v217_v53 }
  0x69   : > { %1594 = vmatprep.mubr.msk.f32.mxu0 %vm1930_vm0, %v1931_v6  ;;  %1693 = vmatprep.mubr.msk.f32.mxu1 %vm1930_vm0, %v1931_v6 }
  0x6c   : > { %1595 = vmatmul.mubr.msk.f32.gmra.mrb[40].mxu0 %vm238_vm1, %v185_v54  ;;  %1694 = vmatmul.mubr.msk.f32.gmra.mrb[40].mxu1 %vm238_vm1, %v218_v55 }
  0x6d   : > { %1597 = vmatprep.mubr.msk.f32.mxu0 %vm1930_vm0, %v1931_v6  ;;  %1696 = vmatprep.mubr.msk.f32.mxu1 %vm1930_vm0, %v1931_v6 }
  0x70   : > { %1598 = vmatmul.mubr.msk.f32.gmra.mrb[42].mxu0 %vm238_vm1, %v186_v56  ;;  %1697 = vmatmul.mubr.msk.f32.gmra.mrb[42].mxu1 %vm238_vm1, %v219_v57 }
  0x71   : > { %1600 = vmatprep.mubr.msk.f32.mxu0 %vm1930_vm0, %v1931_v6  ;;  %1699 = vmatprep.mubr.msk.f32.mxu1 %vm1930_vm0, %v1931_v6 }
  0x74   : > { %1601 = vmatmul.mubr.msk.f32.gmra.mrb[44].mxu0 %vm238_vm1, %v187_v58  ;;  %1700 = vmatmul.mubr.msk.f32.gmra.mrb[44].mxu1 %vm238_vm1, %v220_v59 }
  0x75   : > { %1603 = vmatprep.mubr.msk.f32.mxu0 %vm1930_vm0, %v1931_v6  ;;  %1702 = vmatprep.mubr.msk.f32.mxu1 %vm1930_vm0, %v1931_v6 }
  0x78   : > { %1604 = vmatmul.mubr.msk.f32.gmra.mrb[46].mxu0 %vm238_vm1, %v188_v60  ;;  %1703 = vmatmul.mubr.msk.f32.gmra.mrb[46].mxu1 %vm238_vm1, %v221_v61 }
  0x79   : > { %1606 = vmatprep.mubr.msk.f32.mxu0 %vm1930_vm0, %v1931_v6  ;;  %1705 = vmatprep.mubr.msk.f32.mxu1 %vm1930_vm0, %v1931_v6 }
  0x7c   : > { %1607 = vmatmul.mubr.msk.f32.gmra.mrb[48].mxu0 %vm238_vm1, %v189_v62  ;;  %1706 = vmatmul.mubr.msk.f32.gmra.mrb[48].mxu1 %vm238_vm1, %v222_v63 }
  0x7d   : > { %1609 = vmatprep.mubr.msk.f32.mxu0 %vm1930_vm0, %v1931_v6  ;;  %1708 = vmatprep.mubr.msk.f32.mxu1 %vm1930_vm0, %v1931_v6 }
  0x80   : > { %1610 = vmatmul.mubr.msk.f32.gmra.mrb[50].mxu0 %vm238_vm1, %v190_v0  ;;  %1709 = vmatmul.mubr.msk.f32.gmra.mrb[50].mxu1 %vm238_vm1, %v223_v1 }
  0x81   : > { %1612 = vmatprep.mubr.msk.f32.mxu0 %vm1930_vm0, %v1931_v6  ;;  %1711 = vmatprep.mubr.msk.f32.mxu1 %vm1930_vm0, %v1931_v6 }
  0x84   : > { %1613 = vmatmul.mubr.msk.f32.gmra.mrb[52].mxu0 %vm238_vm1, %v191_v2  ;;  %1712 = vmatmul.mubr.msk.f32.gmra.mrb[52].mxu1 %vm238_vm1, %v224_v3 }
  0x85   : > { %1615 = vmatprep.mubr.msk.f32.mxu0 %vm1930_vm0, %v1931_v6  ;;  %1714 = vmatprep.mubr.msk.f32.mxu1 %vm1930_vm0, %v1931_v6 }
  0x88   : > { %1616 = vmatmul.mubr.msk.f32.gmra.mrb[54].mxu0 %vm238_vm1, %v192_v4  ;;  %1715 = vmatmul.mubr.msk.f32.gmra.mrb[54].mxu1 %vm238_vm1, %v225_v5 }
  0x89   : > { %1618 = vmatprep.mubr.msk.f32.mxu0 %vm1930_vm0, %v1931_v6  ;;  %1717 = vmatprep.mubr.msk.f32.mxu1 %vm1930_vm0, %v1931_v6 }
  0x8c   : > { %1619 = vmatmul.mubr.msk.f32.gmra.mrb[56].mxu0 %vm238_vm1, %v193_v7  ;;  %1718 = vmatmul.mubr.msk.f32.gmra.mrb[56].mxu1 %vm238_vm1, %v226_v8 }
  0x8d   : > { %1621 = vmatprep.mubr.msk.f32.mxu0 %vm1930_vm0, %v1931_v6  ;;  %1720 = vmatprep.mubr.msk.f32.mxu1 %vm1930_vm0, %v1931_v6 }
  0x90   : > { %1622 = vmatmul.mubr.msk.f32.gmra.mrb[58].mxu0 %vm238_vm1, %v194_v9  ;;  %1721 = vmatmul.mubr.msk.f32.gmra.mrb[58].mxu1 %vm238_vm1, %v227_v10 }
  0x91   : > { %1624 = vmatprep.mubr.msk.f32.mxu0 %vm1930_vm0, %v1931_v6  ;;  %1723 = vmatprep.mubr.msk.f32.mxu1 %vm1930_vm0, %v1931_v6 }
  0x94   : > { %1625 = vmatmul.mubr.msk.f32.gmra.mrb[60].mxu0 %vm238_vm1, %v195_v11  ;;  %1724 = vmatmul.mubr.msk.f32.gmra.mrb[60].mxu1 %vm238_vm1, %v228_v12 }
  0x95   : > { %1627 = vmatprep.mubr.msk.f32.mxu0 %vm1930_vm0, %v1931_v6  ;;  %1726 = vmatprep.mubr.msk.f32.mxu1 %vm1930_vm0, %v1931_v6 }
  0x98   : > { %1628 = vmatmul.mubr.msk.f32.gmra.mrb[62].mxu0 %vm238_vm1, %v196_v13  ;;  %1727 = vmatmul.mubr.msk.f32.gmra.mrb[62].mxu1 %vm238_vm1, %v229_v14 }
  0x99   : > { %1630 = vmatprep.mubr.msk.f32.mxu0 %vm1930_vm0, %v1931_v6 }
  0x9c   : > { %1631 = vmatmul.mubr.msk.f32.gmra.mrb[64].mxu0 %vm238_vm1, %v197_v15 }
  0xef   : > { %v500_v16 = vpop.f32.mrb[0].mxu0  ;;  %v665_v17 = vpop.f32.mrb[0].mxu1 }
  0xf0   : > { %825 = vst.msk [vmem:[%s2271_s20] sm:$0xff] %vm824_vm2, %v500_v16  ;;  %v1536_v18 = vpop.f32.mrb[1].mxu0  ;;  %858 = vst.msk [vmem:[%s2271_s20 + $0x108] sm:$0xff] %vm824_vm2, %v665_v17  ;;  %v1635_v6 = vpop.f32.mrb[1].mxu1 }
  0xf3   : > { %v505_v19 = vpop.f32.mrb[2].mxu0  ;;  %v670_v20 = vpop.f32.mrb[2].mxu1 }
  0xf4   : > { %826 = vst.msk [vmem:[%s2271_s20 + $0x8] sm:$0xff] %vm824_vm2, %v505_v19  ;;  %v1539_v21 = vpop.f32.mrb[3].mxu0  ;;  %859 = vst.msk [vmem:[%s2271_s20 + $0x110] sm:$0xff] %vm824_vm2, %v670_v20  ;;  %v1638_v22 = vpop.f32.mrb[3].mxu1 }
  0xf7   : > { %v510_v23 = vpop.f32.mrb[4].mxu0  ;;  %v675_v24 = vpop.f32.mrb[4].mxu1 }
  0xf8   : > { %827 = vst.msk [vmem:[%s2271_s20 + $0x10] sm:$0xff] %vm824_vm2, %v510_v23  ;;  %v1542_v25 = vpop.f32.mrb[5].mxu0  ;;  %860 = vst.msk [vmem:[%s2271_s20 + $0x118] sm:$0xff] %vm824_vm2, %v675_v24  ;;  %v1641_v26 = vpop.f32.mrb[5].mxu1 }
  0xfb   : > { %v515_v27 = vpop.f32.mrb[6].mxu0  ;;  %v680_v28 = vpop.f32.mrb[6].mxu1 }
  0xfc   : > { %828 = vst.msk [vmem:[%s2271_s20 + $0x18] sm:$0xff] %vm824_vm2, %v515_v27  ;;  %v1545_v29 = vpop.f32.mrb[7].mxu0  ;;  %861 = vst.msk [vmem:[%s2271_s20 + $0x120] sm:$0xff] %vm824_vm2, %v680_v28  ;;  %v1644_v30 = vpop.f32.mrb[7].mxu1 }
  0xff   : > { %v520_v31 = vpop.f32.mrb[8].mxu0  ;;  %v685_v32 = vpop.f32.mrb[8].mxu1 }
 0x100   : > { %829 = vst.msk [vmem:[%s2271_s20 + $0x20] sm:$0xff] %vm824_vm2, %v520_v31  ;;  %v1548_v33 = vpop.f32.mrb[9].mxu0  ;;  %862 = vst.msk [vmem:[%s2271_s20 + $0x128] sm:$0xff] %vm824_vm2, %v685_v32  ;;  %v1647_v34 = vpop.f32.mrb[9].mxu1 }
 0x103   : > { %v525_v35 = vpop.f32.mrb[10].mxu0  ;;  %v690_v36 = vpop.f32.mrb[10].mxu1 }
 0x104   : > { %830 = vst.msk [vmem:[%s2271_s20 + $0x28] sm:$0xff] %vm824_vm2, %v525_v35  ;;  %v1551_v37 = vpop.f32.mrb[11].mxu0  ;;  %863 = vst.msk [vmem:[%s2271_s20 + $0x130] sm:$0xff] %vm824_vm2, %v690_v36  ;;  %v1650_v38 = vpop.f32.mrb[11].mxu1 }
 0x107   : > { %v530_v39 = vpop.f32.mrb[12].mxu0  ;;  %v695_v40 = vpop.f32.mrb[12].mxu1 }
 0x108   : > { %831 = vst.msk [vmem:[%s2271_s20 + $0x30] sm:$0xff] %vm824_vm2, %v530_v39  ;;  %v1554_v41 = vpop.f32.mrb[13].mxu0  ;;  %864 = vst.msk [vmem:[%s2271_s20 + $0x138] sm:$0xff] %vm824_vm2, %v695_v40  ;;  %v1653_v42 = vpop.f32.mrb[13].mxu1 }
 0x10b   : > { %v535_v43 = vpop.f32.mrb[14].mxu0  ;;  %v700_v44 = vpop.f32.mrb[14].mxu1 }
 0x10c   : > { %832 = vst.msk [vmem:[%s2271_s20 + $0x38] sm:$0xff] %vm824_vm2, %v535_v43  ;;  %v1557_v45 = vpop.f32.mrb[15].mxu0  ;;  %865 = vst.msk [vmem:[%s2271_s20 + $0x140] sm:$0xff] %vm824_vm2, %v700_v44  ;;  %v1656_v46 = vpop.f32.mrb[15].mxu1 }
 0x10f   : > { %v540_v47 = vpop.f32.mrb[16].mxu0  ;;  %v705_v48 = vpop.f32.mrb[16].mxu1 }
 0x110   : > { %833 = vst.msk [vmem:[%s2271_s20 + $0x40] sm:$0xff] %vm824_vm2, %v540_v47  ;;  %v1560_v49 = vpop.f32.mrb[17].mxu0  ;;  %866 = vst.msk [vmem:[%s2271_s20 + $0x148] sm:$0xff] %vm824_vm2, %v705_v48  ;;  %v1659_v50 = vpop.f32.mrb[17].mxu1 }
 0x113   : > { %v545_v51 = vpop.f32.mrb[18].mxu0  ;;  %v710_v52 = vpop.f32.mrb[18].mxu1 }
 0x114   : > { %834 = vst.msk [vmem:[%s2271_s20 + $0x48] sm:$0xff] %vm824_vm2, %v545_v51  ;;  %v1563_v53 = vpop.f32.mrb[19].mxu0  ;;  %867 = vst.msk [vmem:[%s2271_s20 + $0x150] sm:$0xff] %vm824_vm2, %v710_v52  ;;  %v1662_v54 = vpop.f32.mrb[19].mxu1 }
 0x117   : > { %v550_v55 = vpop.f32.mrb[20].mxu0  ;;  %v715_v56 = vpop.f32.mrb[20].mxu1 }
 0x118   : > { %835 = vst.msk [vmem:[%s2271_s20 + $0x50] sm:$0xff] %vm824_vm2, %v550_v55  ;;  %v1566_v57 = vpop.f32.mrb[21].mxu0  ;;  %868 = vst.msk [vmem:[%s2271_s20 + $0x158] sm:$0xff] %vm824_vm2, %v715_v56  ;;  %v1665_v58 = vpop.f32.mrb[21].mxu1 }
 0x11b   : > { %v555_v59 = vpop.f32.mrb[22].mxu0  ;;  %v720_v60 = vpop.f32.mrb[22].mxu1 }
 0x11c   : > { %836 = vst.msk [vmem:[%s2271_s20 + $0x58] sm:$0xff] %vm824_vm2, %v555_v59  ;;  %v1569_v61 = vpop.f32.mrb[23].mxu0  ;;  %869 = vst.msk [vmem:[%s2271_s20 + $0x160] sm:$0xff] %vm824_vm2, %v720_v60  ;;  %v1668_v62 = vpop.f32.mrb[23].mxu1 }
 0x11f   : > { %v560_v63 = vpop.f32.mrb[24].mxu0  ;;  %v725_v0 = vpop.f32.mrb[24].mxu1 }
 0x120   : > { %837 = vst.msk [vmem:[%s2271_s20 + $0x60] sm:$0xff] %vm824_vm2, %v560_v63  ;;  %v1572_v1 = vpop.f32.mrb[25].mxu0  ;;  %870 = vst.msk [vmem:[%s2271_s20 + $0x168] sm:$0xff] %vm824_vm2, %v725_v0  ;;  %v1671_v2 = vpop.f32.mrb[25].mxu1 }
 0x123   : > { %v565_v3 = vpop.f32.mrb[26].mxu0  ;;  %v730_v4 = vpop.f32.mrb[26].mxu1 }
 0x124   : > { %838 = vst.msk [vmem:[%s2271_s20 + $0x68] sm:$0xff] %vm824_vm2, %v565_v3  ;;  %v1575_v5 = vpop.f32.mrb[27].mxu0  ;;  %871 = vst.msk [vmem:[%s2271_s20 + $0x170] sm:$0xff] %vm824_vm2, %v730_v4  ;;  %v1674_v7 = vpop.f32.mrb[27].mxu1 }
 0x127   : > { %v570_v8 = vpop.f32.mrb[28].mxu0  ;;  %v735_v9 = vpop.f32.mrb[28].mxu1 }
 0x128   : > { %839 = vst.msk [vmem:[%s2271_s20 + $0x70] sm:$0xff] %vm824_vm2, %v570_v8  ;;  %v1578_v10 = vpop.f32.mrb[29].mxu0  ;;  %872 = vst.msk [vmem:[%s2271_s20 + $0x178] sm:$0xff] %vm824_vm2, %v735_v9  ;;  %v1677_v11 = vpop.f32.mrb[29].mxu1 }
 0x12b   : > { %v575_v12 = vpop.f32.mrb[30].mxu0  ;;  %v740_v13 = vpop.f32.mrb[30].mxu1 }
 0x12c   : > { %840 = vst.msk [vmem:[%s2271_s20 + $0x78] sm:$0xff] %vm824_vm2, %v575_v12  ;;  %v1581_v14 = vpop.f32.mrb[31].mxu0  ;;  %873 = vst.msk [vmem:[%s2271_s20 + $0x180] sm:$0xff] %vm824_vm2, %v740_v13  ;;  %v1680_v15 = vpop.f32.mrb[31].mxu1 }
 0x12f   : > { %v580_v16 = vpop.f32.mrb[32].mxu0  ;;  %v745_v17 = vpop.f32.mrb[32].mxu1 }
 0x130   : > { %841 = vst.msk [vmem:[%s2271_s20 + $0x80] sm:$0xff] %vm824_vm2, %v580_v16  ;;  %v1584_v18 = vpop.f32.mrb[33].mxu0  ;;  %874 = vst.msk [vmem:[%s2271_s20 + $0x188] sm:$0xff] %vm824_vm2, %v745_v17  ;;  %v1683_v6 = vpop.f32.mrb[33].mxu1 }
 0x133   : > { %v585_v19 = vpop.f32.mrb[34].mxu0  ;;  %v750_v20 = vpop.f32.mrb[34].mxu1 }
 0x134   : > { %842 = vst.msk [vmem:[%s2271_s20 + $0x88] sm:$0xff] %vm824_vm2, %v585_v19  ;;  %v1587_v21 = vpop.f32.mrb[35].mxu0  ;;  %875 = vst.msk [vmem:[%s2271_s20 + $0x190] sm:$0xff] %vm824_vm2, %v750_v20  ;;  %v1686_v22 = vpop.f32.mrb[35].mxu1 }
 0x137   : > { %v590_v23 = vpop.f32.mrb[36].mxu0  ;;  %v755_v24 = vpop.f32.mrb[36].mxu1 }
 0x138   : > { %843 = vst.msk [vmem:[%s2271_s20 + $0x90] sm:$0xff] %vm824_vm2, %v590_v23  ;;  %v1590_v25 = vpop.f32.mrb[37].mxu0  ;;  %876 = vst.msk [vmem:[%s2271_s20 + $0x198] sm:$0xff] %vm824_vm2, %v755_v24  ;;  %v1689_v26 = vpop.f32.mrb[37].mxu1 }
 0x13b   : > { %v595_v27 = vpop.f32.mrb[38].mxu0  ;;  %v760_v28 = vpop.f32.mrb[38].mxu1 }
 0x13c   : > { %844 = vst.msk [vmem:[%s2271_s20 + $0x98] sm:$0xff] %vm824_vm2, %v595_v27  ;;  %v1593_v29 = vpop.f32.mrb[39].mxu0  ;;  %877 = vst.msk [vmem:[%s2271_s20 + $0x1a0] sm:$0xff] %vm824_vm2, %v760_v28  ;;  %v1692_v30 = vpop.f32.mrb[39].mxu1 }
 0x13f   : > { %v600_v31 = vpop.f32.mrb[40].mxu0  ;;  %v765_v32 = vpop.f32.mrb[40].mxu1 }
 0x140   : > { %845 = vst.msk [vmem:[%s2271_s20 + $0xa0] sm:$0xff] %vm824_vm2, %v600_v31  ;;  %v1596_v33 = vpop.f32.mrb[41].mxu0  ;;  %878 = vst.msk [vmem:[%s2271_s20 + $0x1a8] sm:$0xff] %vm824_vm2, %v765_v32  ;;  %v1695_v34 = vpop.f32.mrb[41].mxu1 }
 0x143   : > { %v605_v35 = vpop.f32.mrb[42].mxu0  ;;  %v770_v36 = vpop.f32.mrb[42].mxu1 }
 0x144   : > { %846 = vst.msk [vmem:[%s2271_s20 + $0xa8] sm:$0xff] %vm824_vm2, %v605_v35  ;;  %v1599_v37 = vpop.f32.mrb[43].mxu0  ;;  %879 = vst.msk [vmem:[%s2271_s20 + $0x1b0] sm:$0xff] %vm824_vm2, %v770_v36  ;;  %v1698_v38 = vpop.f32.mrb[43].mxu1 }
 0x147   : > { %v610_v39 = vpop.f32.mrb[44].mxu0  ;;  %v775_v40 = vpop.f32.mrb[44].mxu1 }
 0x148   : > { %847 = vst.msk [vmem:[%s2271_s20 + $0xb0] sm:$0xff] %vm824_vm2, %v610_v39  ;;  %v1602_v41 = vpop.f32.mrb[45].mxu0  ;;  %880 = vst.msk [vmem:[%s2271_s20 + $0x1b8] sm:$0xff] %vm824_vm2, %v775_v40  ;;  %v1701_v42 = vpop.f32.mrb[45].mxu1 }
 0x14b   : > { %v615_v43 = vpop.f32.mrb[46].mxu0  ;;  %v780_v44 = vpop.f32.mrb[46].mxu1 }
 0x14c   : > { %848 = vst.msk [vmem:[%s2271_s20 + $0xb8] sm:$0xff] %vm824_vm2, %v615_v43  ;;  %v1605_v45 = vpop.f32.mrb[47].mxu0  ;;  %881 = vst.msk [vmem:[%s2271_s20 + $0x1c0] sm:$0xff] %vm824_vm2, %v780_v44  ;;  %v1704_v46 = vpop.f32.mrb[47].mxu1 }
 0x14f   : > { %v620_v47 = vpop.f32.mrb[48].mxu0  ;;  %v785_v48 = vpop.f32.mrb[48].mxu1 }
 0x150   : > { %849 = vst.msk [vmem:[%s2271_s20 + $0xc0] sm:$0xff] %vm824_vm2, %v620_v47  ;;  %v1608_v49 = vpop.f32.mrb[49].mxu0  ;;  %882 = vst.msk [vmem:[%s2271_s20 + $0x1c8] sm:$0xff] %vm824_vm2, %v785_v48  ;;  %v1707_v50 = vpop.f32.mrb[49].mxu1 }
 0x153   : > { %v625_v51 = vpop.f32.mrb[50].mxu0  ;;  %v790_v52 = vpop.f32.mrb[50].mxu1 }
 0x154   : > { %850 = vst.msk [vmem:[%s2271_s20 + $0xc8] sm:$0xff] %vm824_vm2, %v625_v51  ;;  %v1611_v53 = vpop.f32.mrb[51].mxu0  ;;  %883 = vst.msk [vmem:[%s2271_s20 + $0x1d0] sm:$0xff] %vm824_vm2, %v790_v52  ;;  %v1710_v54 = vpop.f32.mrb[51].mxu1 }
 0x157   : > { %v630_v55 = vpop.f32.mrb[52].mxu0  ;;  %v795_v56 = vpop.f32.mrb[52].mxu1 }
 0x158   : > { %851 = vst.msk [vmem:[%s2271_s20 + $0xd0] sm:$0xff] %vm824_vm2, %v630_v55  ;;  %v1614_v57 = vpop.f32.mrb[53].mxu0  ;;  %884 = vst.msk [vmem:[%s2271_s20 + $0x1d8] sm:$0xff] %vm824_vm2, %v795_v56  ;;  %v1713_v58 = vpop.f32.mrb[53].mxu1 }
 0x15b   : > { %v635_v59 = vpop.f32.mrb[54].mxu0  ;;  %v800_v60 = vpop.f32.mrb[54].mxu1 }
 0x15c   : > { %852 = vst.msk [vmem:[%s2271_s20 + $0xd8] sm:$0xff] %vm824_vm2, %v635_v59  ;;  %v1617_v61 = vpop.f32.mrb[55].mxu0  ;;  %885 = vst.msk [vmem:[%s2271_s20 + $0x1e0] sm:$0xff] %vm824_vm2, %v800_v60  ;;  %v1716_v62 = vpop.f32.mrb[55].mxu1 }
 0x15f   : > { %v640_v63 = vpop.f32.mrb[56].mxu0  ;;  %v805_v0 = vpop.f32.mrb[56].mxu1 }
 0x160   : > { %853 = vst.msk [vmem:[%s2271_s20 + $0xe0] sm:$0xff] %vm824_vm2, %v640_v63  ;;  %v1620_v1 = vpop.f32.mrb[57].mxu0  ;;  %886 = vst.msk [vmem:[%s2271_s20 + $0x1e8] sm:$0xff] %vm824_vm2, %v805_v0  ;;  %v1719_v2 = vpop.f32.mrb[57].mxu1 }
 0x163   : > { %v645_v3 = vpop.f32.mrb[58].mxu0  ;;  %v810_v4 = vpop.f32.mrb[58].mxu1 }
 0x164   : > { %854 = vst.msk [vmem:[%s2271_s20 + $0xe8] sm:$0xff] %vm824_vm2, %v645_v3  ;;  %v1623_v5 = vpop.f32.mrb[59].mxu0  ;;  %887 = vst.msk [vmem:[%s2271_s20 + $0x1f0] sm:$0xff] %vm824_vm2, %v810_v4  ;;  %v1722_v7 = vpop.f32.mrb[59].mxu1 }
 0x167   : > { %v650_v8 = vpop.f32.mrb[60].mxu0  ;;  %v815_v9 = vpop.f32.mrb[60].mxu1 }
 0x168   : > { %855 = vst.msk [vmem:[%s2271_s20 + $0xf0] sm:$0xff] %vm824_vm2, %v650_v8  ;;  %v1626_v10 = vpop.f32.mrb[61].mxu0  ;;  %888 = vst.msk [vmem:[%s2271_s20 + $0x1f8] sm:$0xff] %vm824_vm2, %v815_v9  ;;  %v1725_v11 = vpop.f32.mrb[61].mxu1 }
 0x16a   : > { %896 = sbr.rel (!%p1972_p4) target bundleno = 441 (0x1b9), region = 32 }
 0x16b   : > { %v655_v12 = vpop.f32.mrb[62].mxu0  ;;  %v820_v13 = vpop.f32.mrb[62].mxu1 }
 0x16c   : > { %856 = vst.msk [vmem:[%s2271_s20 + $0xf8] sm:$0xff] %vm824_vm2, %v655_v12  ;;  %v1629_v14 = vpop.f32.mrb[63].mxu0  ;;  %889 = vst.msk [vmem:[%s2271_s20 + $0x200] sm:$0xff] %vm824_vm2, %v820_v13  ;;  %v1728_v15 = vpop.f32.mrb[63].mxu1 }
 0x16f   : > { %v660_v16 = vpop.f32.mrb[64].mxu0 }
 0x170   : > { %857 = vst.msk [vmem:[%s2271_s20 + $0x100] sm:$0xff] %vm824_vm2, %v660_v16  ;;  %v1632_v17 = vpop.f32.mrb[65].mxu0 }
 0x171   : > { %s2622_s9 = smov (!%p899_p8, %s898_s9), 65 }
 0x172   : > { %s1427_s25 = sshll.u32 %s2622_s9, 7 }
 0x173   : > { %p1430_p9 = scmp.eq.s32.totalorder %s1427_s25, 0 }
 0x174   : > { %s2416_s27 = sshrl.u32 (!%p1430_p9), %s2622_s9, 6 }
 0x175   : > { %907 = sbr.rel (%p1430_p9) target bundleno = 441 (0x1b9), region = 36  ;;  %p1431_p10 = scmp.le.s32.totalorder (!%p1430_p9), %s2416_s27, 0 }
 0x17c   : > { %1313 = sbr.rel (%p1431_p10) target bundleno = 420 (0x1a4), region = 112  ;;  %s2613_s12 = smov (!%p1431_p10), %s2410_s24 }
 0x17d   : > { %s2614_s17 = smov (!%p1431_p10), %s2271_s20  ;;  %s2425_s26 = smov (!%p1431_p10), 0  }
 0x17e   : > { %s2427_s28 = smov (!%p1431_p10), 0  }
 0x183 LB: >> { %v1095_v18 = vld [vmem:[%s1903_s17] sm:$0xff]  ;;  %v1097_v6 = vld [vmem:[%s1903_s17 + $0x8] sm:$0xff]  ;;  %v1099_v19 = vld [vmem:[%s1903_s17 + $0x10] sm:$0xff]  ;;  %s1223_s29 = sadd.s32 1, %s1907_s26  ;;  %s1089_s28 = sadd.s32 1, %s1911_s28   ;;  %s1911_s28 = sphi %s2427_s28, %s1089_s28   ;;  %s1907_s26 = sphi %s2425_s26, %s2617_s26   ;;  %s1903_s17 = sphi %s2614_s17, %s2616_s17   ;;  %s1899_s12 = sphi %s2613_s12, %s2615_s12  }
 0x184   : >> { %1096 = vst [vmem:[%s1899_s12] sm:$0xff] %v1095_v18  ;;  %1098 = vst [vmem:[%s1899_s12 + $0x8] sm:$0xff] %v1097_v6  ;;  %v1101_v20 = vld [vmem:[%s1903_s17 + $0x18] sm:$0xff]  ;;  %v1103_v21 = vld [vmem:[%s1903_s17 + $0x20] sm:$0xff]  ;;  %p1224_p11 = scmp.ge.s32.totalorder %s1223_s29, %s2416_s27  ;;  %p1088_p12 = scmp.ge.s32.totalorder %s1089_s28, %s2416_s27 }
 0x185   : >> { %1100 = vst [vmem:[%s1899_s12 + $0x10] sm:$0xff] %v1099_v19  ;;  %v1105_v22 = vld [vmem:[%s1903_s17 + $0x28] sm:$0xff]  ;;  %1102 = vst [vmem:[%s1899_s12 + $0x18] sm:$0xff] %v1101_v20  ;;  %v1107_v23 = vld [vmem:[%s1903_s17 + $0x30] sm:$0xff] }
 0x186   : >> { %1104 = vst [vmem:[%s1899_s12 + $0x20] sm:$0xff] %v1103_v21  ;;  %1106 = vst [vmem:[%s1899_s12 + $0x28] sm:$0xff] %v1105_v22  ;;  %v1109_v24 = vld [vmem:[%s1903_s17 + $0x38] sm:$0xff]  ;;  %v1111_v25 = vld [vmem:[%s1903_s17 + $0x40] sm:$0xff]  ;;  %s2624_s29 = smov (%p1224_p11, %s1223_s29), 0 }
 0x187   : >> { %1108 = vst [vmem:[%s1899_s12 + $0x30] sm:$0xff] %v1107_v23  ;;  %1110 = vst [vmem:[%s1899_s12 + $0x38] sm:$0xff] %v1109_v24  ;;  %v1113_v26 = vld [vmem:[%s1903_s17 + $0x48] sm:$0xff]  ;;  %v1115_v27 = vld [vmem:[%s1903_s17 + $0x50] sm:$0xff]  ;;  %s1432_s30 = sshll.u32 %s2624_s29, 9  ;;  %s2617_s26 = smov %s2624_s29 }
 0x188   : >> { %1112 = vst [vmem:[%s1899_s12 + $0x40] sm:$0xff] %v1111_v25  ;;  %v1117_v28 = vld [vmem:[%s1903_s17 + $0x58] sm:$0xff]  ;;  %1114 = vst [vmem:[%s1899_s12 + $0x48] sm:$0xff] %v1113_v26  ;;  %v1119_v29 = vld [vmem:[%s1903_s17 + $0x60] sm:$0xff]  ;;  %s2483_s3 = scalar_lea.vmem %s2271_s20, %s1432_s30 [#allocation2]   ;;  %s2486_s4 = scalar_lea.vmem %s2410_s24, %s1432_s30  }
 0x189   : >> { %1116 = vst [vmem:[%s1899_s12 + $0x50] sm:$0xff] %v1115_v27  ;;  %1118 = vst [vmem:[%s1899_s12 + $0x58] sm:$0xff] %v1117_v28  ;;  %v1121_v30 = vld [vmem:[%s1903_s17 + $0x68] sm:$0xff]  ;;  %v1123_v31 = vld [vmem:[%s1903_s17 + $0x70] sm:$0xff] }
 0x18a   : >> { %1120 = vst [vmem:[%s1899_s12 + $0x60] sm:$0xff] %v1119_v29  ;;  %1122 = vst [vmem:[%s1899_s12 + $0x68] sm:$0xff] %v1121_v30  ;;  %v1125_v32 = vld [vmem:[%s1903_s17 + $0x78] sm:$0xff]  ;;  %v1127_v33 = vld [vmem:[%s1903_s17 + $0x80] sm:$0xff] }
 0x18b   : >> { %1124 = vst [vmem:[%s1899_s12 + $0x70] sm:$0xff] %v1123_v31  ;;  %v1129_v34 = vld [vmem:[%s1903_s17 + $0x88] sm:$0xff]  ;;  %1126 = vst [vmem:[%s1899_s12 + $0x78] sm:$0xff] %v1125_v32  ;;  %v1131_v35 = vld [vmem:[%s1903_s17 + $0x90] sm:$0xff] }
 0x18c   : >> { %1128 = vst [vmem:[%s1899_s12 + $0x80] sm:$0xff] %v1127_v33  ;;  %1130 = vst [vmem:[%s1899_s12 + $0x88] sm:$0xff] %v1129_v34  ;;  %v1133_v36 = vld [vmem:[%s1903_s17 + $0x98] sm:$0xff]  ;;  %v1135_v37 = vld [vmem:[%s1903_s17 + $0xa0] sm:$0xff] }
 0x18d   : >> { %1132 = vst [vmem:[%s1899_s12 + $0x90] sm:$0xff] %v1131_v35  ;;  %1134 = vst [vmem:[%s1899_s12 + $0x98] sm:$0xff] %v1133_v36  ;;  %v1137_v38 = vld [vmem:[%s1903_s17 + $0xa8] sm:$0xff]  ;;  %v1139_v39 = vld [vmem:[%s1903_s17 + $0xb0] sm:$0xff] }
 0x18e   : >> { %1136 = vst [vmem:[%s1899_s12 + $0xa0] sm:$0xff] %v1135_v37  ;;  %v1141_v40 = vld [vmem:[%s1903_s17 + $0xb8] sm:$0xff]  ;;  %1138 = vst [vmem:[%s1899_s12 + $0xa8] sm:$0xff] %v1137_v38  ;;  %v1143_v41 = vld [vmem:[%s1903_s17 + $0xc0] sm:$0xff] }
 0x18f   : >> { %1140 = vst [vmem:[%s1899_s12 + $0xb0] sm:$0xff] %v1139_v39  ;;  %1142 = vst [vmem:[%s1899_s12 + $0xb8] sm:$0xff] %v1141_v40  ;;  %v1145_v42 = vld [vmem:[%s1903_s17 + $0xc8] sm:$0xff]  ;;  %v1147_v43 = vld [vmem:[%s1903_s17 + $0xd0] sm:$0xff] }
 0x190   : >> { %1144 = vst [vmem:[%s1899_s12 + $0xc0] sm:$0xff] %v1143_v41  ;;  %1146 = vst [vmem:[%s1899_s12 + $0xc8] sm:$0xff] %v1145_v42  ;;  %v1149_v44 = vld [vmem:[%s1903_s17 + $0xd8] sm:$0xff]  ;;  %v1151_v45 = vld [vmem:[%s1903_s17 + $0xe0] sm:$0xff] }
 0x191   : >> { %1148 = vst [vmem:[%s1899_s12 + $0xd0] sm:$0xff] %v1147_v43  ;;  %v1153_v46 = vld [vmem:[%s1903_s17 + $0xe8] sm:$0xff]  ;;  %1150 = vst [vmem:[%s1899_s12 + $0xd8] sm:$0xff] %v1149_v44  ;;  %v1155_v47 = vld [vmem:[%s1903_s17 + $0xf0] sm:$0xff] }
 0x192   : >> { %1152 = vst [vmem:[%s1899_s12 + $0xe0] sm:$0xff] %v1151_v45  ;;  %1154 = vst [vmem:[%s1899_s12 + $0xe8] sm:$0xff] %v1153_v46  ;;  %v1157_v48 = vld [vmem:[%s1903_s17 + $0xf8] sm:$0xff]  ;;  %v1159_v49 = vld [vmem:[%s1903_s17 + $0x100] sm:$0xff] }
 0x193   : >> { %1156 = vst [vmem:[%s1899_s12 + $0xf0] sm:$0xff] %v1155_v47  ;;  %1158 = vst [vmem:[%s1899_s12 + $0xf8] sm:$0xff] %v1157_v48  ;;  %v1161_v50 = vld [vmem:[%s1903_s17 + $0x108] sm:$0xff]  ;;  %v1163_v51 = vld [vmem:[%s1903_s17 + $0x110] sm:$0xff] }
 0x194   : >> { %1160 = vst [vmem:[%s1899_s12 + $0x100] sm:$0xff] %v1159_v49  ;;  %v1165_v52 = vld [vmem:[%s1903_s17 + $0x118] sm:$0xff]  ;;  %1162 = vst [vmem:[%s1899_s12 + $0x108] sm:$0xff] %v1161_v50  ;;  %v1167_v53 = vld [vmem:[%s1903_s17 + $0x120] sm:$0xff] }
 0x195   : >> { %1164 = vst [vmem:[%s1899_s12 + $0x110] sm:$0xff] %v1163_v51  ;;  %1166 = vst [vmem:[%s1899_s12 + $0x118] sm:$0xff] %v1165_v52  ;;  %v1169_v54 = vld [vmem:[%s1903_s17 + $0x128] sm:$0xff]  ;;  %v1171_v55 = vld [vmem:[%s1903_s17 + $0x130] sm:$0xff] }
 0x196   : >> { %1168 = vst [vmem:[%s1899_s12 + $0x120] sm:$0xff] %v1167_v53  ;;  %1170 = vst [vmem:[%s1899_s12 + $0x128] sm:$0xff] %v1169_v54  ;;  %v1173_v56 = vld [vmem:[%s1903_s17 + $0x138] sm:$0xff]  ;;  %v1175_v57 = vld [vmem:[%s1903_s17 + $0x140] sm:$0xff] }
 0x197   : >> { %1172 = vst [vmem:[%s1899_s12 + $0x130] sm:$0xff] %v1171_v55  ;;  %v1177_v58 = vld [vmem:[%s1903_s17 + $0x148] sm:$0xff]  ;;  %1174 = vst [vmem:[%s1899_s12 + $0x138] sm:$0xff] %v1173_v56  ;;  %v1179_v59 = vld [vmem:[%s1903_s17 + $0x150] sm:$0xff] }
 0x198   : >> { %1176 = vst [vmem:[%s1899_s12 + $0x140] sm:$0xff] %v1175_v57  ;;  %1178 = vst [vmem:[%s1899_s12 + $0x148] sm:$0xff] %v1177_v58  ;;  %v1181_v60 = vld [vmem:[%s1903_s17 + $0x158] sm:$0xff]  ;;  %v1183_v61 = vld [vmem:[%s1903_s17 + $0x160] sm:$0xff] }
 0x199   : >> { %1180 = vst [vmem:[%s1899_s12 + $0x150] sm:$0xff] %v1179_v59  ;;  %1182 = vst [vmem:[%s1899_s12 + $0x158] sm:$0xff] %v1181_v60  ;;  %v1185_v62 = vld [vmem:[%s1903_s17 + $0x168] sm:$0xff]  ;;  %v1187_v63 = vld [vmem:[%s1903_s17 + $0x170] sm:$0xff] }
 0x19a   : >> { %1184 = vst [vmem:[%s1899_s12 + $0x160] sm:$0xff] %v1183_v61  ;;  %v1189_v0 = vld [vmem:[%s1903_s17 + $0x178] sm:$0xff]  ;;  %1186 = vst [vmem:[%s1899_s12 + $0x168] sm:$0xff] %v1185_v62  ;;  %v1191_v1 = vld [vmem:[%s1903_s17 + $0x180] sm:$0xff] }
 0x19b   : >> { %1188 = vst [vmem:[%s1899_s12 + $0x170] sm:$0xff] %v1187_v63  ;;  %1190 = vst [vmem:[%s1899_s12 + $0x178] sm:$0xff] %v1189_v0  ;;  %v1193_v2 = vld [vmem:[%s1903_s17 + $0x188] sm:$0xff]  ;;  %v1195_v3 = vld [vmem:[%s1903_s17 + $0x190] sm:$0xff] }
 0x19c   : >> { %1192 = vst [vmem:[%s1899_s12 + $0x180] sm:$0xff] %v1191_v1  ;;  %1194 = vst [vmem:[%s1899_s12 + $0x188] sm:$0xff] %v1193_v2  ;;  %v1197_v4 = vld [vmem:[%s1903_s17 + $0x198] sm:$0xff]  ;;  %v1199_v5 = vld [vmem:[%s1903_s17 + $0x1a0] sm:$0xff] }
 0x19d   : >> { %1196 = vst [vmem:[%s1899_s12 + $0x190] sm:$0xff] %v1195_v3  ;;  %v1201_v7 = vld [vmem:[%s1903_s17 + $0x1a8] sm:$0xff]  ;;  %1198 = vst [vmem:[%s1899_s12 + $0x198] sm:$0xff] %v1197_v4  ;;  %v1203_v8 = vld [vmem:[%s1903_s17 + $0x1b0] sm:$0xff]  ;;  %1091 = sbr.rel (!%p1088_p12) target bundleno = 387 (0x183), region = 118 }
 0x19e   : >> { %1200 = vst [vmem:[%s1899_s12 + $0x1a0] sm:$0xff] %v1199_v5  ;;  %1202 = vst [vmem:[%s1899_s12 + $0x1a8] sm:$0xff] %v1201_v7  ;;  %v1205_v9 = vld [vmem:[%s1903_s17 + $0x1b8] sm:$0xff]  ;;  %v1207_v10 = vld [vmem:[%s1903_s17 + $0x1c0] sm:$0xff] }
 0x19f   : >> { %1204 = vst [vmem:[%s1899_s12 + $0x1b0] sm:$0xff] %v1203_v8  ;;  %1206 = vst [vmem:[%s1899_s12 + $0x1b8] sm:$0xff] %v1205_v9  ;;  %v1209_v11 = vld [vmem:[%s1903_s17 + $0x1c8] sm:$0xff]  ;;  %v1211_v12 = vld [vmem:[%s1903_s17 + $0x1d0] sm:$0xff] }
 0x1a0   : >> { %1208 = vst [vmem:[%s1899_s12 + $0x1c0] sm:$0xff] %v1207_v10  ;;  %v1213_v13 = vld [vmem:[%s1903_s17 + $0x1d8] sm:$0xff]  ;;  %1210 = vst [vmem:[%s1899_s12 + $0x1c8] sm:$0xff] %v1209_v11  ;;  %v1215_v14 = vld [vmem:[%s1903_s17 + $0x1e0] sm:$0xff] }
 0x1a1   : >> { %1212 = vst [vmem:[%s1899_s12 + $0x1d0] sm:$0xff] %v1211_v12  ;;  %1214 = vst [vmem:[%s1899_s12 + $0x1d8] sm:$0xff] %v1213_v13  ;;  %v1217_v15 = vld [vmem:[%s1903_s17 + $0x1e8] sm:$0xff]  ;;  %v1219_v16 = vld [vmem:[%s1903_s17 + $0x1f0] sm:$0xff] }
 0x1a2   : >> { %1216 = vst [vmem:[%s1899_s12 + $0x1e0] sm:$0xff] %v1215_v14  ;;  %1218 = vst [vmem:[%s1899_s12 + $0x1e8] sm:$0xff] %v1217_v15  ;;  %v1221_v17 = vld [vmem:[%s1903_s17 + $0x1f8] sm:$0xff]  ;;  %s2616_s17 = smov %s2483_s3 }
 0x1a3   : >> { %1220 = vst [vmem:[%s1899_s12 + $0x1f0] sm:$0xff] %v1219_v16  ;;  %1222 = vst [vmem:[%s1899_s12 + $0x1f8] sm:$0xff] %v1221_v17  ;;  %s2615_s12 = smov %s2486_s4 }
 0x1a4 PF: > { %s2591_s5 = sand.u32 63, %s2622_s9   ;;  %s1443_s6 = sshll.u32 %s2416_s27, 9 }
 0x1a5   : > { %s1234_s7 = scalar_lea.vmem %s2271_s20, %s1443_s6 [#allocation2]   ;;  %s1236_s8 = scalar_lea.vmem %s2410_s24, %s1443_s6  }
 0x1a6   : > { %p1437_p13 = scmp.le.s32.totalorder %s2591_s5, 0 }
 0x1a7   : > { %s1913_s11 = smov (!%p1437_p13), %s1236_s8   ;;  %s1917_s14 = smov (!%p1437_p13), %s1234_s7  }
 0x1a8   : > { %1327 = sbr.rel (%p1437_p13) target bundleno = 441 (0x1b9), region = 123  ;;  %s1921_s15 = smov (!%p1437_p13), 0  }
 0x1a9   : > { %s1925_s18 = smov (!%p1437_p13), 0  }
 0x1af LB: >> { %v1246_v18 = vld [vmem:[%s1919_s14] sm:$0xff]  ;;  %s1248_s19 = sadd.s32 1, %s1923_s15  ;;  %s1240_s18 = sadd.s32 1, %s1927_s18   ;;  %s1927_s18 = sphi %s1925_s18, %s1240_s18   ;;  %s1923_s15 = sphi %s1921_s15, %s1922_s15   ;;  %s1919_s14 = sphi %s1917_s14, %s1253_s14   ;;  %s1915_s11 = sphi %s1913_s11, %s1254_s11  }
 0x1b0   : >> { %1247 = vst [vmem:[%s1915_s11] sm:$0xff] %v1246_v18  ;;  %p1249_p0 = scmp.ge.s32.totalorder %s1248_s19, %s2591_s5  ;;  %p1239_p1 = scmp.ge.s32.totalorder %s1240_s18, %s2591_s5 }
 0x1b2   : >> { %s2626_s19 = smov (%p1249_p0, %s1248_s19), 0  ;;  %1242 = sbr.rel (!%p1239_p1) target bundleno = 431 (0x1af), region = 129 }
 0x1b3   : >> { %s1438_s20 = sshll.u32 %s2626_s19, 3  ;;  %s1922_s15 = smov %s2626_s19  }
 0x1b4   : >> { %s1253_s14 = scalar_lea.vmem %s1234_s7, %s1438_s20 [#allocation2]   ;;  %s1254_s11 = scalar_lea.vmem %s1236_s8, %s1438_s20  }
 0x1b9 PF: > { %p9_p2 = scmp.ge.s32.totalorder %s1962_s13, 6   ;;  %s2618_s9 = smov %s1891_s10 }
 0x1ba   : > { %s2619_s10 = smov %s1970_s16  ;;  %s2620_s11 = smov %s1962_s13 }
 0x1bb   :  { %11 = sbr.rel (!%p9_p2) target bundleno = 2 (0x2), region = 140 }

</bundles_post_ra>
